<compile_context>
chip_gen: v6e
topology: v6e:2x2x1
jax: 0.10.0
libtpu: 0.0.40
codegen_flags: <defaults>
</compile_context>

<pallas_src>
import numpy as np
import jax
import jax.numpy as jnp
from jax.experimental import pallas as pl
from jax.experimental.pallas import tpu as pltpu


def _round_up(x, m):
    return (x + m - 1) // m * m


def _make_fused_basis(n_fft, win_length, k_pad):
    """Fused inverse-rDFT basis (window folded in), shape (n_fft, k_pad).

    Columns [0, F) hold the cosine basis, columns [k_pad//2, k_pad//2 + F) the
    (negative) sine basis; the remaining columns are zeros so the single MXU
    contraction dim is 128-aligned.  Also returns the centered rectangular
    window (torch.istft default window=None -> ones(win_length), padded).
    """
    F = n_fft // 2 + 1
    k = np.arange(F, dtype=np.float64)[:, None]
    n = np.arange(n_fft, dtype=np.float64)[None, :]
    ang = 2.0 * np.pi * k * n / n_fft
    w = np.full((F, 1), 2.0)
    w[0, 0] = 1.0
    if n_fft % 2 == 0:
        w[-1, 0] = 1.0
    left = (n_fft - win_length) // 2
    window = np.zeros((n_fft,), dtype=np.float64)
    window[left:left + win_length] = 1.0
    # x[n] = (1/N)[Re X0 + (-1)^n Re X_{N/2} + 2 sum_k (ReXk cos - ImXk sin)]
    C = (w * np.cos(ang)) / n_fft * window[None, :]          # (F, n_fft)
    S = (-w * np.sin(ang)) / n_fft * window[None, :]         # (F, n_fft)
    basis = np.zeros((n_fft, k_pad), dtype=np.float64)
    half = k_pad // 2
    basis[:, :F] = C.T
    basis[:, half:half + F] = S.T
    return basis, window


def inverse_spectrogram(mag, phase, *, n_fft, win_length, hop_length,
                        t_tile=256, matmul_dtype=jnp.float32):
    """Equivalent of InverseSpectrogram.forward((mag, phase)).

    mag, phase: (B, n_fft//2+1, T).  Returns (B, hop_length * (T - 1))
    (torch.istft defaults: rectangular window, center=True, length=None).
    """
    B, F, T = mag.shape
    assert F == n_fft // 2 + 1, "freq dim must equal n_fft//2+1"
    assert t_tile % 128 == 0, "t_tile must be a multiple of 128"

    k_pad = _round_up(2 * F, 128)   # fused, 128-aligned contraction dim
    k_half = k_pad // 2             # sublane-aligned offset of the imag rows
    basis_np, window = _make_fused_basis(n_fft, win_length, k_pad)
    basis = jnp.asarray(basis_np, dtype=matmul_dtype)

    mag_f = mag.astype(jnp.float32)
    phase_f = phase.astype(jnp.float32)
    if T > t_tile:
        t_blk = t_tile
        T_pad = _round_up(T, t_blk)
        if T_pad != T:
            padding = ((0, 0), (0, 0), (0, T_pad - T))
            mag_f = jnp.pad(mag_f, padding)
            phase_f = jnp.pad(phase_f, padding)
    else:
        t_blk = T_pad = T

    def kernel(mag_ref, phase_ref, basis_ref, o_ref, x_ref):
        # mag_ref/phase_ref: (F, t_blk); basis_ref: (n_fft, k_pad)
        # x_ref (VMEM scratch): (k_pad, t_blk); o_ref: (n_fft, t_blk)
        x_ref[...] = jnp.zeros_like(x_ref)          # clear zero-pad rows (cheap)
        m = mag_ref[...]
        p = phase_ref[...]                          # cos/sin + mul stay in f32
        x_ref[pl.ds(0, F), :] = (m * jnp.cos(p)).astype(x_ref.dtype)
        x_ref[pl.ds(k_half, F), :] = (m * jnp.sin(p)).astype(x_ref.dtype)
        o_ref[...] = jnp.dot(basis_ref[...], x_ref[...],
                             preferred_element_type=jnp.float32
                             ).astype(o_ref.dtype)

    grid = (B, T_pad // t_blk)
    frames = pl.pallas_call(
        kernel,
        out_shape=jax.ShapeDtypeStruct((B, n_fft, T_pad), jnp.float32),
        grid_spec=pltpu.PrefetchScalarGridSpec(
            num_scalar_prefetch=0,
            grid=grid,
            in_specs=[
                pl.BlockSpec((pl.Squeezed(), F, t_blk), lambda b, t: (b, 0, t)),
                pl.BlockSpec((pl.Squeezed(), F, t_blk), lambda b, t: (b, 0, t)),
                # Constant fused basis: index map never changes so it is only
                # fetched once.  NOTE: default pipelining still double-buffers
                # it; at very large n_fft on v7x (64 MiB VMEM) single-buffer it
                # or raise vmem_limit_bytes in CompilerParams.
                pl.BlockSpec((n_fft, k_pad), lambda b, t: (0, 0)),
            ],
            out_specs=pl.BlockSpec((pl.Squeezed(), n_fft, t_blk),
                                   lambda b, t: (b, 0, t)),
            scratch_shapes=[pltpu.VMEM((k_pad, t_blk), matmul_dtype)],
        ),
        compiler_params=pltpu.CompilerParams(
            dimension_semantics=("parallel", "parallel")),
    )(mag_f, phase_f, basis)                        # (B, n_fft, T_pad) frames

    frames = frames[:, :, :T]

    # ---- overlap-add + static window-envelope normalization + center trim ----
    L = n_fft + hop_length * (T - 1)
    start = n_fft // 2
    out_len = hop_length * (T - 1)

    # Window envelope is fully static -> numpy at trace time (no runtime scatter).
    env = np.zeros((L,), np.float64)
    wsq = window ** 2
    for t in range(T):
        env[t * hop_length:t * hop_length + n_fft] += wsq
    env_trim = env[start:start + out_len]
    if np.any(env_trim < 1e-11):
        raise ValueError("OLA window envelope has zeros; torch.istft would fail.")
    inv_env = jnp.asarray(1.0 / env_trim, jnp.float32)

    if n_fft % hop_length == 0:
        # Shift-sum OLA: r static slice-adds instead of a serialized XLA scatter.
        r = n_fft // hop_length
        n_hops = T - 1 + r
        fr = frames.reshape(B, r, hop_length, T)    # frame sample j*hop+s -> fr[:, j, s, :]
        acc = jnp.zeros((B, hop_length, n_hops), jnp.float32)
        for j in range(r):
            acc = acc.at[:, :, j:j + T].add(fr[:, j])
        sig = jnp.transpose(acc, (0, 2, 1)).reshape(B, n_hops * hop_length)
    else:
        # TODO(synk): hop not dividing n_fft falls back to a scatter-add OLA.
        idx = (np.arange(T)[:, None] * hop_length
               + np.arange(n_fft)[None, :]).reshape(-1)
        sig = jnp.zeros((B, L), jnp.float32).at[:, idx].add(
            jnp.transpose(frames, (0, 2, 1)).reshape(B, -1))

    return sig[:, start:start + out_len] * inv_env


def _reference_istft_np(mag, phase, n_fft, win_length, hop_length):
    """Pure-numpy reference mirroring torch.istft (rect window, center=True)."""
    spec = mag.astype(np.float64) * np.exp(1j * phase.astype(np.float64))  # (B, F, T)
    B, F, T = spec.shape
    frames = np.fft.irfft(spec, n=n_fft, axis=1)                           # (B, n_fft, T)
    left = (n_fft - win_length) // 2
    window = np.zeros(n_fft)
    window[left:left + win_length] = 1.0
    frames = frames * window[None, :, None]
    L = n_fft + hop_length * (T - 1)
    y = np.zeros((B, L))
    env = np.zeros(L)
    for t in range(T):
        y[:, t * hop_length:t * hop_length + n_fft] += frames[:, :, t]
        env[t * hop_length:t * hop_length + n_fft] += window ** 2
    start = n_fft // 2
    out_len = hop_length * (T - 1)
    return y[:, start:start + out_len] / env[start:start + out_len]


if __name__ == "__main__":
    n_fft, win_length, hop_length = 64, 64, 16
    B = 2
    F = n_fft // 2 + 1
    T = 8

    key = jax.random.PRNGKey(0)
    k_mag, k_phase = jax.random.split(key)
    mag = jnp.abs(jax.random.normal(k_mag, (B, F, T), dtype=jnp.float32))
    phase = jax.random.uniform(k_phase, (B, F, T), dtype=jnp.float32,
                               minval=-np.pi, maxval=np.pi)
    ref = _reference_istft_np(np.asarray(mag), np.asarray(phase),
                              n_fft, win_length, hop_length)

    # f32-operand path (tight tolerance).
    sig = jax.block_until_ready(
        inverse_spectrogram(mag, phase, n_fft=n_fft, win_length=win_length,
                            hop_length=hop_length))
    np.testing.assert_allclose(np.asarray(sig), ref, rtol=1e-3, atol=1e-4)
    assert sig.shape == (B, hop_length * (T - 1))

    # bf16-operand / f32-accumulate MXU path (v6e / v7x), looser tolerance.
    sig_bf16 = jax.block_until_ready(
        inverse_spectrogram(mag, phase, n_fft=n_fft, win_length=win_length,
                            hop_length=hop_length, matmul_dtype=jnp.bfloat16))
    np.testing.assert_allclose(np.asarray(sig_bf16), ref, rtol=2e-2, atol=1e-2)

    # Multi-tile / padded-T path (T > t_tile) to exercise the pipelined grid.
    T2 = 160
    k3, k4 = jax.random.split(jax.random.PRNGKey(1))
    mag2 = jnp.abs(jax.random.normal(k3, (B, F, T2), dtype=jnp.float32))
    phase2 = jax.random.uniform(k4, (B, F, T2), dtype=jnp.float32,
                                minval=-np.pi, maxval=np.pi)
    ref2 = _reference_istft_np(np.asarray(mag2), np.asarray(phase2),
                               n_fft, win_length, hop_length)
    sig2 = jax.block_until_ready(
        inverse_spectrogram(mag2, phase2, n_fft=n_fft, win_length=win_length,
                            hop_length=hop_length, t_tile=128))
    np.testing.assert_allclose(np.asarray(sig2), ref2, rtol=1e-3, atol=1e-4)

    print("KERNEL_OK")
</pallas_src>

<mosaic_0001>
module attributes {stable_mosaic.version = 11 : i64} {
  func.func @kernel(%arg0: i32, %arg1: i32, %arg2: memref<1x33x8xf32, #tpu.memory_space<vmem>>, %arg3: memref<1x33x8xf32, #tpu.memory_space<vmem>>, %arg4: memref<64x128xf32, #tpu.memory_space<vmem>>, %arg5: memref<1x64x8xf32, #tpu.memory_space<vmem>>, %arg6: memref<128x8xf32, #tpu.memory_space<vmem>>) attributes {dimension_semantics = [#tpu.dimension_semantics<parallel>, #tpu.dimension_semantics<parallel>], iteration_bounds = array<i64: 2, 1>, scalar_prefetch = 0 : i64, scratch_operands = 1 : i64, tpu.core_type = #tpu.core_type<tc>, window_params = [{transform_indices = @transform_0, window_bounds = array<i64: 1, 33, 8>}, {transform_indices = @transform_1, window_bounds = array<i64: 1, 33, 8>}, {pipeline_mode = #tpu.pipeline_mode<synchronous>, transform_indices = @transform_2, window_bounds = array<i64: 64, 128>}, {transform_indices = @transform_3, window_bounds = array<i64: 1, 64, 8>}]} {
    %cst = arith.constant 0.000000e+00 : f32
    %0 = vector.broadcast %cst : f32 to vector<128x8xf32>
    %c0 = arith.constant 0 : index
    %c0_0 = arith.constant 0 : index
    %1 = vector.load %arg6[%c0, %c0_0] : memref<128x8xf32, #tpu.memory_space<vmem>>, vector<128x8xf32>
    tpu.vector_store %arg6[%c0, %c0_0], %0 {strides = array<i32>} : memref<128x8xf32, #tpu.memory_space<vmem>>, vector<128x8xf32>,
    %c0_1 = arith.constant 0 : index
    %c0_2 = arith.constant 0 : index
    %c0_3 = arith.constant 0 : index
    %2 = vector.load %arg2[%c0_1, %c0_2, %c0_3] : memref<1x33x8xf32, #tpu.memory_space<vmem>>, vector<1x33x8xf32>
    %3 = vector.shape_cast %2 : vector<1x33x8xf32> to vector<33x8xf32>
    %c0_4 = arith.constant 0 : index
    %c0_5 = arith.constant 0 : index
    %c0_6 = arith.constant 0 : index
    %4 = vector.load %arg3[%c0_4, %c0_5, %c0_6] : memref<1x33x8xf32, #tpu.memory_space<vmem>>, vector<1x33x8xf32>
    %5 = vector.shape_cast %4 : vector<1x33x8xf32> to vector<33x8xf32>
    %6 = math.cos %5 : vector<33x8xf32>
    %7 = arith.mulf %3, %6 : vector<33x8xf32>
    %c0_7 = arith.constant 0 : index
    %c0_8 = arith.constant 0 : index
    %8 = vector.load %arg6[%c0_7, %c0_8] : memref<128x8xf32, #tpu.memory_space<vmem>>, vector<33x8xf32>
    tpu.vector_store %arg6[%c0_7, %c0_8], %7 {strides = array<i32>} : memref<128x8xf32, #tpu.memory_space<vmem>>, vector<33x8xf32>,
    %9 = math.sin %5 : vector<33x8xf32>
    %10 = arith.mulf %3, %9 : vector<33x8xf32>
    %c64 = arith.constant 64 : index
    %c0_9 = arith.constant 0 : index
    %11 = vector.load %arg6[%c64, %c0_9] : memref<128x8xf32, #tpu.memory_space<vmem>>, vector<33x8xf32>
    tpu.vector_store %arg6[%c64, %c0_9], %10 {strides = array<i32>} : memref<128x8xf32, #tpu.memory_space<vmem>>, vector<33x8xf32>,
    %c0_10 = arith.constant 0 : index
    %c0_11 = arith.constant 0 : index
    %12 = vector.load %arg4[%c0_10, %c0_11] : memref<64x128xf32, #tpu.memory_space<vmem>>, vector<64x128xf32>
    %c0_12 = arith.constant 0 : index
    %c0_13 = arith.constant 0 : index
    %13 = vector.load %arg6[%c0_12, %c0_13] : memref<128x8xf32, #tpu.memory_space<vmem>>, vector<128x8xf32>
    %cst_14 = arith.constant dense<0.000000e+00> : vector<64x8xf32>
    %14 = tpu.matmul %12, %13, %cst_14 {dimension_numbers = #tpu.dot_dimension_numbers<[1], [0], [0], [1], [0, 0, 1, 1], [], []>} : vector<64x128xf32>, vector<128x8xf32>, vector<64x8xf32> -> vector<64x8xf32>
    %c0_15 = arith.constant 0 : index
    %c0_16 = arith.constant 0 : index
    %c0_17 = arith.constant 0 : index
    %15 = vector.load %arg5[%c0_15, %c0_16, %c0_17] : memref<1x64x8xf32, #tpu.memory_space<vmem>>, vector<1x64x8xf32>
    %16 = vector.shape_cast %15 : vector<1x64x8xf32> to vector<64x8xf32>
    %17 = vector.shape_cast %14 : vector<64x8xf32> to vector<1x64x8xf32>
    tpu.vector_store %arg5[%c0_15, %c0_16, %c0_17], %17 {strides = array<i32>} : memref<1x64x8xf32, #tpu.memory_space<vmem>>, vector<1x64x8xf32>,
    return
  }
  func.func @transform_0(%arg0: i32, %arg1: i32) -> (i32, i32, i32) {
    %c0_i32 = arith.constant 0 : i32
    %c0_i32_0 = arith.constant 0 : i32
    return %arg0, %c0_i32, %arg1 : i32, i32, i32
  }
  func.func @transform_1(%arg0: i32, %arg1: i32) -> (i32, i32, i32) {
    %c0_i32 = arith.constant 0 : i32
    %c0_i32_0 = arith.constant 0 : i32
    return %arg0, %c0_i32, %arg1 : i32, i32, i32
  }
  func.func @transform_2(%arg0: i32, %arg1: i32) -> (i32, i32) {
    %c0_i32 = arith.constant 0 : i32
    %c0_i32_0 = arith.constant 0 : i32
    %c0_i32_1 = arith.constant 0 : i32
    return %c0_i32, %c0_i32_0 : i32, i32
  }
  func.func @transform_3(%arg0: i32, %arg1: i32) -> (i32, i32, i32) {
    %c0_i32 = arith.constant 0 : i32
    %c0_i32_0 = arith.constant 0 : i32
    return %arg0, %c0_i32, %arg1 : i32, i32, i32
  }
}

</mosaic_0001>

<bundles_post_ra>
// kernel: tpu_custom_call.1
= control target key start
LH: loop header
LB: loop body
LE: loop exit
PB: predicated region body
PF: predicated region fallthrough
CT: control target
= control target key end

     0   :  { %s1829_s12 = smov 0   ;;  %s1831_s13 = smov 0   ;;  %s2408_s0 = inlined_call_operand.vmem [shape: f32[2,33,8], index: 0, kind: input, shape index: {}]   ;;  %s2409_s1 = inlined_call_operand.vmem [shape: f32[2,33,8], index: 1, kind: input, shape index: {}]   ;;  %s2410_s2 = inlined_call_operand.vmem [shape: f32[64,128], index: 2, kind: input, shape index: {}]   ;;  %s2411_s3 = inlined_call_operand.vmem [shape: f32[2,64,8], index: 3, kind: output, shape index: {}]  }
   0x1   :  { %s1833_s14 = smov 0  }
   0x2 LB: > { %s25_s15 = sadd.s32 1, %s1796_s13  ;;  %p1558_p0 = scmp.ge.s32.totalorder %s1800_s14, 1  ;;  %s1800_s14 = sphi %s1833_s14, %s13_s14   ;;  %s1796_s13 = sphi %s1831_s13, %s2419_s13   ;;  %s1792_s12 = sphi %s1829_s12, %s2418_s12  }
   0x3   : > { %p27_p1 = scmp.ge.s32.totalorder %s25_s15, 2  ;;  %p171_p2 = scmp.lt.s32.totalorder %s1800_s14, 3 }
   0x5   : > { %s2421_s15 = smov (%p27_p1, %s25_s15), 0  ;;  %p172_p3 = pnand %p1558_p0, %p171_p2 }
   0x6   : > { %p209_p4 = scmp.lt.s32.totalorder (!%p172_p3), %s1792_s12, 1 }
   0x7   : > { %175 = sbr.rel (%p172_p3) target bundleno = 414 (0x19e), region = 32 }
   0xc   : > { %vm233_vm0 = vcmask 64512   ;;  %v1802_v0 = vmov 0.0   ;;  %s2423_s12 = smov (!%p209_p4, %s1792_s12), 1  ;;  %v1803_v33 = vmov 683565275  }
   0xd   : > { %249 = vst.msk [vmem:[#allocation2 + $0x78] sm:$0xff] %vm233_vm0, %v1802_v0  ;;  %234 = vst.msk [vmem:[#allocation2] sm:$0xff] %vm233_vm0, %v1802_v0  ;;  %s1706_s16 = smul.u32 40, %s2423_s12  ;;  %v1804_v35 = vmov 2475754826  }
   0xe   : > { %235 = vst.msk [vmem:[#allocation2 + $0x8] sm:$0xff] %vm233_vm0, %v1802_v0  ;;  %236 = vst.msk [vmem:[#allocation2 + $0x10] sm:$0xff] %vm233_vm0, %v1802_v0  ;;  %v1805_v37 = vmov 2131351028   ;;  %v1806_v39 = vmov 2102212464  }
   0xf   : > { %237 = vst.msk [vmem:[#allocation2 + $0x18] sm:$0xff] %vm233_vm0, %v1802_v0  ;;  %238 = vst.msk [vmem:[#allocation2 + $0x20] sm:$0xff] %vm233_vm0, %v1802_v0  ;;  %s1872_s19 = scalar_lea.vmem %s2409_s1, %s1706_s16  ;;  %v1807_v41 = vmov 920167782   ;;  %v1808_v49 = vmov 1326507024   ;;  %s2168_s26 = scalar_lea.vmem %s2408_s0, %s1706_s16 }
  0x10   : > { %239 = vst.msk [vmem:[#allocation2 + $0x28] sm:$0xff] %vm233_vm0, %v1802_v0  ;;  %240 = vst.msk [vmem:[#allocation2 + $0x30] sm:$0xff] %vm233_vm0, %v1802_v0  ;;  %v1875_v1 = vld [vmem:[%s1872_s19 + $0x20] sm:$0x1]  ;;  %v1880_v6 = vld [vmem:[%s1872_s19 + $0x18] sm:$0xff]  ;;  %s1605_s16 = sshll.u32 %s2423_s12, 6 }
  0x11   : > { %241 = vst.msk [vmem:[#allocation2 + $0x38] sm:$0xff] %vm233_vm0, %v1802_v0  ;;  %242 = vst.msk [vmem:[#allocation2 + $0x40] sm:$0xff] %vm233_vm0, %v1802_v0  ;;  %v672_v4 = vand.u32 2147483647, %v1875_v1  ;;  %v675_v5 = vand.u32 2139095040, %v1875_v1  ;;  %v1884_v9 = vld [vmem:[%s1872_s19 + $0x10] sm:$0xff] }
  0x12   : > { %243 = vst.msk [vmem:[#allocation2 + $0x48] sm:$0xff] %vm233_vm0, %v1802_v0  ;;  %244 = vst.msk [vmem:[#allocation2 + $0x50] sm:$0xff] %vm233_vm0, %v1802_v0  ;;  %v569_v8 = vand.u32 2147483647, %v1880_v6  ;;  %v572_v11 = vand.u32 2139095040, %v1880_v6  ;;  %v469_v16 = vand.u32 2139095040, %v1884_v9 }
  0x13   : > { %245 = vst.msk [vmem:[#allocation2 + $0x58] sm:$0xff] %vm233_vm0, %v1802_v0  ;;  %246 = vst.msk [vmem:[#allocation2 + $0x60] sm:$0xff] %vm233_vm0, %v1802_v0  ;;  %v676_v10 = vshrl.u32 %v675_v5, 23  ;;  %v679_v12 = vand.u32 8388607, %v672_v4  ;;  %vm674_vm14 = vcmp.lt.s32.totalorder %v1875_v1, 0 }
  0x14   : > { %247 = vst.msk [vmem:[#allocation2 + $0x68] sm:$0xff] %vm233_vm0, %v1802_v0  ;;  %248 = vst.msk [vmem:[#allocation2 + $0x70] sm:$0xff] %vm233_vm0, %v1802_v0  ;;  %v1339_v2 = vld [vmem:[#allocation2 + $0x78] sm:$0xff]  ;;  %v576_v13 = vand.u32 8388607, %v569_v8  ;;  %v573_v15 = vshrl.u32 %v572_v11, 23 }
  0x15   : > { %1630 = vmatprep.subr.mxu0 %v1339_v2  ;;  %1674 = vmatprep.subr.mxu1 %v1339_v2  ;;  %v1579_v14 = vadd.s32 4294967169, %v676_v10  ;;  %v470_v19 = vshrl.u32 %v469_v16, 23  ;;  %v680_v20 = vor.u32 8388608, %v679_v12  ;;  %v466_v22 = vand.u32 2147483647, %v1884_v9 }
  0x16   : > { %1631 = vmatpush3.msra.mxu0 %v1339_v2  ;;  %1690 = vmatpush3.msra.mxu1 %v1339_v2  ;;  %v1575_v18 = vadd.s32 4294967169, %v573_v15  ;;  %v577_v21 = vor.u32 8388608, %v576_v13 }
  0x17   : > { %v682_v17 = vadd.s32 1, %v1579_v14  ;;  %v1571_v24 = vadd.s32 4294967169, %v470_v19  ;;  %v1893_v28 = vshll.u32 %v680_v20, 8  ;;  %v1899_v30 = vand.u32 8388607, %v466_v22 }
  0x18   : > { %v579_v23 = vadd.s32 1, %v1575_v18  ;;  %v1895_v29 = vshll.u32 %v577_v21, 8 }
  0x19   : > { %vm683_vm1 = vcmp.gt.s32.totalorder %v682_v17, 0  ;;  %v1901_v31 = vadd.s32 1, %v1571_v24 }
  0x1a   : > { %v684_v25 = vsel %vm683_vm1, %v682_v17, 0  ;;  %vm580_vm2 = vcmp.gt.s32.totalorder %v579_v23, 0  ;;  %vm2008_vm1 = vcmp.le.f32.partialorder %v672_v4, 0.7853982 }
  0x1b   : > { %v1338_v3 = vld [vmem:[#allocation2 + $0x70] sm:$0xff]  ;;  %v1337_v7 = vld [vmem:[#allocation2 + $0x68] sm:$0xff]  ;;  %v685_v26 = vshrl.u32 %v684_v25, 5  ;;  %v686_v27 = vand.u32 31, %v684_v25  ;;  %v581_v43 = vsel %vm580_vm2, %v579_v23, 0  ;;  %vm477_vm9 = vcmp.gt.s32.totalorder %v1901_v31, 0 }
  0x1c   : > { %1632 = vmatprep.subr.mxu0 %v1338_v3  ;;  %1675 = vmatprep.subr.mxu1 %v1338_v3  ;;  %v582_v56 = vshrl.u32 %v581_v43, 5  ;;  %v583_v57 = vand.u32 31, %v581_v43 }
  0x1d   : > { %1633 = vmatpush3.msra.mxu0 %v1338_v3  ;;  %1691 = vmatpush3.msra.mxu1 %v1338_v3  ;;  %v687_v32 = vsub.s32 32, %v686_v27  ;;  %v689_v34 = vshll.u32 %v1803_v33, %v686_v27  ;;  %v692_v36 = vshll.u32 %v1804_v35, %v686_v27  ;;  %v695_v38 = vshll.u32 %v1805_v37, %v686_v27 }
  0x1e   : > { %1634 = vmatprep.subr.mxu0 %v1337_v7  ;;  %1676 = vmatprep.subr.mxu1 %v1337_v7  ;;  %v698_v40 = vshll.u32 %v1806_v39, %v686_v27  ;;  %v701_v42 = vshll.u32 %v1807_v41, %v686_v27  ;;  %vm704_vm3 = vcmp.lt.s32.totalorder %v685_v26, 1  ;;  %vm705_vm4 = vcmp.lt.s32.totalorder %v685_v26, 2 }
  0x1f   : > { %1635 = vmatpush3.msra.mxu0 %v1337_v7  ;;  %1692 = vmatpush3.msra.mxu1 %v1337_v7  ;;  %v688_v44 = vshrl.u32 %v1803_v33, %v687_v32  ;;  %v690_v45 = vshrl.u32 %v1804_v35, %v687_v32  ;;  %v693_v46 = vshrl.u32 %v1805_v37, %v687_v32  ;;  %vm706_vm5 = vcmp.lt.s32.totalorder %v685_v26, 3 }
  0x20   : > { %v696_v47 = vshrl.u32 %v1806_v39, %v687_v32  ;;  %v699_v48 = vshrl.u32 %v1807_v41, %v687_v32  ;;  %v702_v50 = vshrl.u32 %v1808_v49, %v687_v32  ;;  %vm707_vm6 = vcmp.lt.s32.totalorder %v685_v26, 4 }
  0x21   : > { %v691_v51 = vor.u32 %v690_v45, %v689_v34  ;;  %v694_v52 = vor.u32 %v693_v46, %v692_v36  ;;  %v584_v2 = vsub.s32 32, %v583_v57  ;;  %v586_v10 = vshll.u32 %v1803_v33, %v583_v57 }
  0x22   : > { %v697_v53 = vor.u32 %v696_v47, %v695_v38  ;;  %v700_v54 = vor.u32 %v699_v48, %v698_v40  ;;  %v703_v55 = vor.u32 %v702_v50, %v701_v42  ;;  %v589_v20 = vshll.u32 %v1804_v35, %v583_v57 }
  0x23   : > { %v708_v58 = vsel %vm704_vm3, %v688_v44, %v691_v51  ;;  %v712_v60 = vsel %vm704_vm3, %v691_v51, %v694_v52  ;;  %v585_v14 = vshrl.u32 %v1803_v33, %v584_v2  ;;  %v587_v19 = vshrl.u32 %v1804_v35, %v584_v2  ;;  %v1954_v51 = vld [vmem:[%s1872_s19 + $0x8] sm:$0xff] }
  0x24   : > { %v709_v59 = vsel %vm707_vm6, %v697_v53, 2102212464  ;;  %v716_v61 = vsel %vm704_vm3, %v694_v52, %v697_v53  ;;  %v713_v63 = vsel %vm707_vm6, %v700_v54, 920167782  ;;  %v717_v0 = vsel %vm707_vm6, %v703_v55, 1326507024 }
  0x25   : > { %v710_v62 = vsel %vm706_vm5, %v694_v52, %v709_v59  ;;  %v714_v5 = vsel %vm706_vm5, %v697_v53, %v713_v63  ;;  %v718_v7 = vsel %vm706_vm5, %v700_v54, %v717_v0  ;;  %v590_v21 = vshrl.u32 %v1805_v37, %v584_v2 }
  0x26   : > { %v711_v3 = vsel %vm705_vm4, %v708_v58, %v710_v62  ;;  %v715_v11 = vsel %vm705_vm4, %v712_v60, %v714_v5  ;;  %v719_v12 = vsel %vm705_vm4, %v716_v61, %v718_v7  ;;  %v592_v23 = vshll.u32 %v1805_v37, %v583_v57 }
  0x27   : > { %v727_v13 = vmul.u32 %v1893_v28, %v711_v3  ;;  %v1928_v15 = vmul.u32.u64.low %v1893_v28, %v719_v12  ;;  %v1929_v16 = vmul.u32.u64.high %v1893_v28, %v719_v12, %v1928_v15  ;;  %v593_v24 = vshrl.u32 %v1806_v39, %v584_v2 }
  0x28   : > { %v1932_v17 = vmul.u32.u64.low %v1893_v28, %v715_v11  ;;  %v1933_v18 = vmul.u32.u64.high %v1893_v28, %v715_v11, %v1932_v17  ;;  %v595_v25 = vshll.u32 %v1806_v39, %v583_v57  ;;  %v596_v26 = vshrl.u32 %v1807_v41, %v584_v2 }
  0x29   : > { %v598_v27 = vshll.u32 %v1807_v41, %v583_v57  ;;  %v588_v32 = vor.u32 %v587_v19, %v586_v10  ;;  %v591_v28 = vor.u32 %v590_v21, %v589_v20  ;;  %v599_v34 = vshrl.u32 %v1808_v49, %v584_v2 }
  0x2a   : > { %vm601_vm7 = vcmp.lt.s32.totalorder %v582_v56, 1  ;;  %vm729_vm8 = vc.u32 %v1929_v16, %v1932_v17  ;;  %v730_v36 = vadd.s32 1, %v1933_v18  ;;  %v594_v38 = vor.u32 %v593_v24, %v592_v23 }
  0x2b   : > { %v597_v40 = vor.u32 %v596_v26, %v595_v25  ;;  %v600_v42 = vor.u32 %v599_v34, %v598_v27  ;;  %vm602_vm10 = vcmp.lt.s32.totalorder %v582_v56, 2  ;;  %vm603_vm11 = vcmp.lt.s32.totalorder %v582_v56, 3 }
  0x2c   : > { %v731_v43 = vsel %vm729_vm8, %v730_v36, %v1933_v18  ;;  %vm604_vm12 = vcmp.lt.s32.totalorder %v582_v56, 4  ;;  %v605_v44 = vsel %vm601_vm7, %v585_v14, %v588_v32  ;;  %v609_v45 = vsel %vm601_vm7, %v588_v32, %v591_v28 }
  0x2d   : > { %v732_v46 = vadd.s32 %v731_v43, %v727_v13  ;;  %v606_v47 = vsel %vm604_vm12, %v594_v38, 2102212464  ;;  %v610_v48 = vsel %vm604_vm12, %v597_v40, 920167782  ;;  %v613_v50 = vsel %vm601_vm7, %v591_v28, %v594_v38 }
  0x2e   : > { %v607_v52 = vsel %vm603_vm11, %v591_v28, %v606_v47  ;;  %v611_v53 = vsel %vm603_vm11, %v594_v38, %v610_v48  ;;  %v614_v54 = vsel %vm604_vm12, %v600_v42, 1326507024  ;;  %v363_v55 = vand.u32 2147483647, %v1954_v51 }
  0x2f   : > { %v733_v57 = vadd.s32 536870912, %v732_v46  ;;  %v612_v58 = vsel %vm602_vm10, %v609_v45, %v611_v53  ;;  %v615_v59 = vsel %vm603_vm11, %v597_v40, %v614_v54  ;;  %v478_v60 = vsel %vm477_vm9, %v1901_v31, 0 }
  0x30   : > { %v608_v61 = vsel %vm602_vm10, %v605_v44, %v607_v52  ;;  %v616_v62 = vsel %vm602_vm10, %v613_v50, %v615_v59  ;;  %v1967_v63 = vmul.u32.u64.low %v1895_v29, %v612_v58  ;;  %v1968_v0 = vmul.u32.u64.high %v1895_v29, %v612_v58, %v1967_v63 }
  0x31   : > { %v734_v2 = vshrl.u32 %v733_v57, 30  ;;  %v1972_v3 = vmul.u32.u64.low %v1895_v29, %v616_v62  ;;  %v1973_v5 = vmul.u32.u64.high %v1895_v29, %v616_v62, %v1972_v3  ;;  %v366_v7 = vand.u32 2139095040, %v1954_v51 }
  0x32   : > { %v474_v10 = vor.u32 8388608, %v1899_v30  ;;  %v480_v11 = vand.u32 31, %v478_v60  ;;  %v624_v12 = vmul.u32 %v1895_v29, %v608_v61  ;;  %v627_v56 = vadd.s32 1, %v1968_v0 }
  0x33   : > { %v735_v31 = vshll.u32 %v734_v2, 30  ;;  %vm626_vm13 = vc.u32 %v1973_v5, %v1967_v63  ;;  %v367_v15 = vshrl.u32 %v366_v7, 23  ;;  %v1985_v18 = vand.u32 8388607, %v363_v55 }
  0x34   : > { %v481_v13 = vsub.s32 32, %v480_v11  ;;  %v628_v30 = vsel %vm626_vm13, %v627_v56, %v1968_v0  ;;  %v483_v19 = vshll.u32 %v1803_v33, %v480_v11  ;;  %v486_v29 = vshll.u32 %v1804_v35, %v480_v11 }
  0x35   : > { %v1979_v14 = vsub.s32 %v732_v46, %v735_v31  ;;  %v1991_v20 = vshll.u32 %v474_v10, 8  ;;  %v629_v23 = vadd.s32 %v628_v30, %v624_v12  ;;  %v479_v26 = vshrl.u32 %v478_v60, 5 }
  0x36   : > { %v484_v24 = vshrl.u32 %v1804_v35, %v481_v13  ;;  %v487_v25 = vshrl.u32 %v1805_v37, %v481_v13  ;;  %v489_v27 = vshll.u32 %v1805_v37, %v480_v11  ;;  %v490_v32 = vshrl.u32 %v1806_v39, %v481_v13 }
  0x37   : > { %v738_v21 = vsub.s32 0, %v1979_v14  ;;  %v492_v28 = vshll.u32 %v1806_v39, %v480_v11  ;;  %v630_v36 = vadd.s32 536870912, %v629_v23  ;;  %v1567_v38 = vadd.s32 4294967169, %v367_v15 }
  0x38   : > { %v371_v40 = vor.u32 8388608, %v1985_v18  ;;  %v728_v42 = vadd.s32 %v1932_v17, %v1929_v16  ;;  %v493_v43 = vshrl.u32 %v1807_v41, %v481_v13  ;;  %v495_v44 = vshll.u32 %v1807_v41, %v480_v11 }
  0x39   : > { %v1580_v34 = vmin.u32 %v738_v21, %v1979_v14  ;;  %v496_v45 = vshrl.u32 %v1808_v49, %v481_v13  ;;  %v758_v47 = vsub.s32 4, %v734_v2  ;;  %v485_v48 = vor.u32 %v484_v24, %v483_v19 }
  0x3a   : > { %v488_v50 = vor.u32 %v487_v25, %v486_v29  ;;  %v631_v52 = vshrl.u32 %v630_v36, 30  ;;  %v491_v53 = vor.u32 %v490_v32, %v489_v27  ;;  %v494_v54 = vor.u32 %v493_v43, %v492_v28 }
  0x3b   : > { %v740_v46 = vclz %v1580_v34  ;;  %vm498_vm15 = vcmp.lt.s32.totalorder %v479_v26, 1  ;;  %vm500_vm2 = vcmp.lt.s32.totalorder %v479_v26, 3  ;;  %vm501_vm3 = vcmp.lt.s32.totalorder %v479_v26, 4 }
  0x3c   : > { %v373_v17 = vadd.s32 1, %v1567_v38  ;;  %v632_v58 = vshll.u32 %v631_v52, 30  ;;  %v482_v59 = vshrl.u32 %v1803_v33, %v481_v13  ;;  %v497_v60 = vor.u32 %v496_v45, %v495_v44 }
  0x3d   : > { %v1581_v16 = vadd.s32 4294967294, %v740_v46  ;;  %v507_v61 = vsel %vm501_vm3, %v494_v54, 920167782  ;;  %v759_v62 = vsel %vm674_vm14, %v758_v47, %v734_v2  ;;  %vm499_vm5 = vcmp.lt.s32.totalorder %v479_v26, 2 }
  0x3e   : > { %v506_v4 = vsel %vm498_vm15, %v485_v48, %v488_v50  ;;  %v2017_v3 = vsub.s32 %v629_v23, %v632_v58  ;;  %v503_v7 = vsel %vm501_vm3, %v491_v53, 2102212464  ;;  %v508_v10 = vsel %vm500_vm2, %v491_v53, %v507_v61 }
  0x3f   : > { %vm1582_vm4 = vcmp.lt.s32.totalorder %v1581_v16, 0  ;;  %v510_v56 = vsel %vm498_vm15, %v488_v50, %v491_v53  ;;  %v655_v15 = vsub.s32 4, %v631_v52  ;;  %v502_v2 = vsel %vm498_vm15, %v482_v59, %v485_v48  ;;  %v2063_v59 = vld [vmem:[%s1872_s19] sm:$0xff]  ;;  %s232_s19 = scalar_lea.vmem %s2411_s3, %s1605_s16 }
  0x40   : > { %v743_v0 = vsel %vm1582_vm4, 0, %v1581_v16  ;;  %v635_v13 = vsub.s32 0, %v2017_v3  ;;  %v511_v18 = vsel %vm501_vm3, %v497_v60, 1326507024  ;;  %v504_v29 = vsel %vm500_vm2, %v488_v50, %v503_v7 }
  0x41   : > { %v744_v11 = vsub.s32 32, %v743_v0  ;;  %v745_v31 = vshll.u32 %v1979_v14, %v743_v0  ;;  %v748_v12 = vsub.s32 4294967266, %v743_v0  ;;  %v512_v21 = vsel %vm500_vm2, %v494_v54, %v511_v18 }
  0x42   : > { %v1576_v23 = vmin.u32 %v635_v13, %v2017_v3  ;;  %v509_v14 = vsel %vm499_vm5, %v506_v4, %v508_v10  ;;  %v513_v24 = vsel %vm499_vm5, %v510_v56, %v512_v21  ;;  %vm374_vm6 = vcmp.gt.s32.totalorder %v373_v17, 0 }
  0x43   : > { %v746_v30 = vshrl.u32 %v728_v42, %v744_v11  ;;  %v749_v19 = vadd.s32 127, %v748_v12  ;;  %v2032_v32 = vmul.u32.u64.low %v1991_v20, %v513_v24  ;;  %v2033_v28 = vmul.u32.u64.high %v1991_v20, %v513_v24, %v2032_v32 }
  0x44   : > { %v2037_v34 = vsel %vm2008_vm1, 0, %v759_v62  ;;  %vm571_vm7 = vcmp.lt.s32.totalorder %v1880_v6, 0  ;;  %v637_v36 = vclz %v1576_v23  ;;  %v505_v38 = vsel %vm499_vm5, %v502_v2, %v504_v29 }
  0x45   : > { %v747_v25 = vor.u32 %v746_v30, %v745_v31  ;;  %v750_v27 = vshll.u32 %v749_v19, 23  ;;  %v2042_v44 = vmul.u32.u64.low %v1991_v20, %v509_v14  ;;  %v2043_v45 = vmul.u32.u64.high %v1991_v20, %v509_v14, %v2042_v44 }
  0x46   : > { %vm2048_vm8 = vcmp.le.f32.partialorder %v569_v8, 0.7853982  ;;  %v1577_v47 = vadd.s32 4294967294, %v637_v36  ;;  %v375_v48 = vsel %vm374_vm6, %v373_v17, 0  ;;  %v2052_v50 = vshll.u32 %v371_v40, 8 }
  0x47   : > { %v751_v42 = vor.u32 4788187, %v750_v27  ;;  %v754_v43 = vcvt.s32.f32 %v747_v25  ;;  %v1295_v53 = vadd.s32 3, %v2037_v34  ;;  %v625_v54 = vadd.s32 %v1967_v63, %v1973_v5 }
  0x48   : > { %v656_v16 = vsel %vm571_vm7, %v655_v15, %v631_v52  ;;  %vm1578_vm9 = vcmp.lt.s32.totalorder %v1577_v47, 0  ;;  %v521_v58 = vmul.u32 %v1991_v20, %v505_v38  ;;  %vm523_vm10 = vc.u32 %v2033_v28, %v2042_v44  ;;  %v1316_v38 = vld [vmem:[%s2410_s2] sm:$0xff] }
  0x49   : > { %v752_v26 = vand.u32 2147483647, %v751_v42  ;;  %v377_v8 = vand.u32 31, %v375_v48  ;;  %v640_v17 = vsel %vm1578_vm9, 0, %v1577_v47  ;;  %v524_v60 = vadd.s32 1, %v2043_v45  ;;  %v1320_v42 = vld [vmem:[%s2410_s2 + $0x20] sm:$0xff]  ;;  %1662 = vmatprep.mubr.f32.mxu0 %v1316_v38 }
  0x4a   : > { %v260_v61 = vand.u32 2147483647, %v2063_v59  ;;  %v641_v62 = vsub.s32 32, %v640_v17  ;;  %v642_v63 = vshll.u32 %v2017_v3, %v640_v17  ;;  %v645_v5 = vsub.s32 4294967266, %v640_v17  ;;  %1668 = vmatprep.mubr.f32.mxu1 %v1320_v42 }
  0x4b   : > { %v755_v40 = vmul.f32 %v754_v43, %v752_v26  ;;  %v378_v52 = vsub.s32 32, %v377_v8  ;;  %v2068_v0 = vand.u32 3, %v1295_v53  ;;  %v2072_v20 = vsel %vm2048_vm8, 0, %v656_v16 }
  0x4c   : > { %v525_v7 = vsel %vm523_vm10, %v524_v60, %v2043_v45  ;;  %v643_v10 = vshrl.u32 %v625_v54, %v641_v62  ;;  %v646_v11 = vadd.s32 127, %v645_v5  ;;  %v2075_v12 = vshrl.u32 %v375_v48, 5 }
  0x4d   : > { %v756_v4 = vxor.u32 2147483648, %v755_v40  ;;  %v526_v31 = vadd.s32 %v525_v7, %v521_v58  ;;  %v380_v3 = vshll.u32 %v1803_v33, %v377_v8  ;;  %v381_v13 = vshrl.u32 %v1804_v35, %v378_v52 }
  0x4e   : > { %v383_v15 = vshll.u32 %v1804_v35, %v377_v8  ;;  %v644_v18 = vor.u32 %v643_v10, %v642_v63  ;;  %v647_v30 = vshll.u32 %v646_v11, 23  ;;  %v384_v29 = vshrl.u32 %v1805_v37, %v378_v52 }
  0x4f   : > { %v757_v56 = vsel %vm674_vm14, %v756_v4, %v755_v40  ;;  %v527_v19 = vadd.s32 536870912, %v526_v31  ;;  %v386_v21 = vshll.u32 %v1805_v37, %v377_v8  ;;  %v387_v23 = vshrl.u32 %v1806_v39, %v378_v52 }
  0x50   : > { %v760_v2 = vsel %vm2008_vm1, %v1875_v1, %v757_v56  ;;  %v648_v14 = vor.u32 4788187, %v647_v30  ;;  %v651_v24 = vcvt.s32.f32 %v644_v18  ;;  %v1191_v27 = vadd.s32 3, %v2072_v20 }
  0x51   : > { %1758 = vcosq.f32 %v760_v2  ;;  %v528_v25 = vshrl.u32 %v527_v19, 30  ;;  %v389_v32 = vshll.u32 %v1806_v39, %v377_v8  ;;  %v390_v57 = vshrl.u32 %v1807_v41, %v378_v52 }
  0x52   : > { %1760 = vsinq.f32 %v760_v2  ;;  %v392_v36 = vshll.u32 %v1807_v41, %v377_v8  ;;  %v649_v43 = vand.u32 2147483647, %v648_v14  ;;  %vm468_vm11 = vcmp.lt.s32.totalorder %v1884_v9, 0 }
  0x53   : > { %v529_v45 = vshll.u32 %v528_v25, 30  ;;  %v393_v47 = vshrl.u32 %v1808_v49, %v378_v52  ;;  %vm395_vm12 = vcmp.lt.s32.totalorder %v2075_v12, 1  ;;  %v382_v48 = vor.u32 %v381_v13, %v380_v3 }
  0x54   : > { %v385_v26 = vor.u32 %v384_v29, %v383_v15  ;;  %v388_v53 = vor.u32 %v387_v23, %v386_v21  ;;  %v391_v54 = vor.u32 %v390_v57, %v389_v32  ;;  %vm1301_vm13 = vcmp.eq.s32.totalorder %v2068_v0, 2 }
  0x55   : > { %v652_v16 = vmul.f32 %v651_v24, %v649_v43  ;;  %v2102_v58 = vsub.s32 %v526_v31, %v529_v45  ;;  %v394_v8 = vor.u32 %v393_v47, %v392_v36  ;;  %vm398_vm14 = vcmp.lt.s32.totalorder %v2075_v12, 4 }
  0x56   : > { %vm1298_vm15 = vcmp.eq.s32.totalorder %v2068_v0, 0  ;;  %v2106_v40 = vand.u32 3, %v1191_v27  ;;  %vm2110_vm1 = vcmp.le.f32.partialorder %v466_v22, 0.7853982  ;;  %v379_v60 = vshrl.u32 %v1803_v33, %v378_v52 }
  0x57   : > { %vm397_vm2 = vcmp.lt.s32.totalorder %v2075_v12, 3  ;;  %v263_v62 = vand.u32 2139095040, %v2063_v59  ;;  %vm1297_vm3 = vcmp.lt.s32.totalorder %v2068_v0, 2  ;;  %v653_v63 = vxor.u32 2147483648, %v652_v16 }
  0x58   : > { %v532_v5 = vsub.s32 0, %v2102_v58  ;;  %v552_v4 = vsub.s32 4, %v528_v25  ;;  %v400_v7 = vsel %vm398_vm14, %v388_v53, 2102212464  ;;  %vm764_vm4 = vweird.f32 %v1875_v1 }
  0x59   : > { %vm396_vm5 = vcmp.lt.s32.totalorder %v2075_v12, 2  ;;  %v403_v22 = vsel %vm395_vm12, %v382_v48, %v385_v26  ;;  %v404_v52 = vsel %vm398_vm14, %v391_v54, 920167782  ;;  %v408_v10 = vsel %vm398_vm14, %v394_v8, 1326507024 }
  0x5a   : > { %v654_v11 = vsel %vm571_vm7, %v653_v63, %v652_v16  ;;  %v1572_v31 = vmin.u32 %v532_v5, %v2102_v58  ;;  %v405_v56 = vsel %vm397_vm2, %v388_v53, %v404_v52  ;;  %v407_v3 = vsel %vm395_vm12, %v385_v26, %v388_v53  ;;  %v2189_v53 = vld [vmem:[%s2168_s26 + $0x20] sm:$0x1] }
  0x5b   : > { %v657_v13 = vsel %vm2048_vm8, %v1880_v6, %v654_v11  ;;  %v399_v15 = vsel %vm395_vm12, %v379_v60, %v382_v48  ;;  %v401_v2 = vsel %vm397_vm2, %v385_v26, %v400_v7  ;;  %v409_v18 = vsel %vm397_vm2, %v391_v54, %v408_v10 }
  0x5c   : > { %vm784_vm6 = vcmask 57344   ;;  %1762 = vcosq.f32 %v657_v13  ;;  %v522_v30 = vadd.s32 %v2042_v44, %v2033_v28  ;;  %v534_v19 = vclz %v1572_v31 }
  0x5d   : > { %v406_v46 = vsel %vm396_vm5, %v403_v22, %v405_v56  ;;  %1764 = vsinq.f32 %v657_v13  ;;  %v553_v29 = vsel %vm468_vm11, %v552_v4, %v528_v25  ;;  %v410_v21 = vsel %vm396_vm5, %v407_v3, %v409_v18 }
  0x5e   : > { %v264_v23 = vshrl.u32 %v263_v62, 23  ;;  %v2153_v14 = vpop.eup %1758  ;;  %v1573_v24 = vadd.s32 4294967294, %v534_v19  ;;  %v402_v27 = vsel %vm396_vm5, %v399_v15, %v401_v2  ;;  %v2178_v42 = vsel %vm2110_vm1, 0, %v553_v29 }
  0x5f   : > { %v2158_v28 = vmul.u32.u64.low %v2052_v50, %v410_v21  ;;  %v2159_v44 = vmul.u32.u64.high %v2052_v50, %v410_v21, %v2158_v28  ;;  %v2161_v32 = vpop.eup %1760  ;;  %v771_v25 = vxor.u32 2147483648, %v2153_v14  ;;  %v267_v43 = vand.u32 8388607, %v260_v61 }
  0x60   : > { %v2172_v57 = vmul.u32.u64.low %v2052_v50, %v406_v46  ;;  %v2173_v36 = vmul.u32.u64.high %v2052_v50, %v406_v46, %v2172_v57  ;;  %v1563_v12 = vadd.s32 4294967169, %v264_v23  ;;  %v768_v38 = vxor.u32 2147483648, %v2161_v32 }
  0x61   : > { %vm1574_vm7 = vcmp.lt.s32.totalorder %v1573_v24, 0  ;;  %v1303_v45 = vsel %vm1301_vm13, %v771_v25, %v2161_v32  ;;  %v418_v48 = vmul.u32 %v2052_v50, %v402_v27  ;;  %v1087_v63 = vadd.s32 3, %v2178_v42 }
  0x62   : > { %v537_v47 = vsel %vm1574_vm7, 0, %v1573_v24  ;;  %v270_v26 = vadd.s32 1, %v1563_v12  ;;  %v1300_v54 = vsel %vm1298_vm15, %v2153_v14, %v768_v38  ;;  %vm420_vm8 = vc.u32 %v2159_v44, %v2172_v57 }
  0x63   : > { %v538_v16 = vsub.s32 32, %v537_v47  ;;  %v539_v8 = vshll.u32 %v2102_v58, %v537_v47  ;;  %v542_v60 = vsub.s32 4294967266, %v537_v47  ;;  %v1304_v62 = vsel %vm1297_vm3, %v1300_v54, %v1303_v45  ;;  %v2240_v47 = vld [vmem:[%s2168_s26 + $0x18] sm:$0xff] }
  0x64   : > { %v421_v50 = vadd.s32 1, %v2173_v36  ;;  %v1305_v5 = vsel %vm764_vm4, nan, %v1304_v62  ;;  %vm271_vm9 = vcmp.gt.s32.totalorder %v270_v26, 0  ;;  %v268_v52 = vor.u32 8388608, %v267_v43 }
  0x65   : > { %v540_v4 = vshrl.u32 %v522_v30, %v538_v16  ;;  %v543_v7 = vadd.s32 127, %v542_v60  ;;  %v1310_v22 = vmul.f32 %v1305_v5, %v2189_v53  ;;  %v272_v10 = vsel %vm271_vm9, %v270_v26, 0 }
  0x66   : > { %v422_v58 = vsel %vm420_vm8, %v421_v50, %v2173_v36  ;;  %vm661_vm10 = vweird.f32 %v1880_v6  ;;  %vm1193_vm12 = vcmp.lt.s32.totalorder %v2106_v40, 2  ;;  %vm1194_vm13 = vcmp.eq.s32.totalorder %v2106_v40, 0 }
  0x67   : > { %v541_v0 = vor.u32 %v540_v4, %v539_v8  ;;  %v544_v11 = vshll.u32 %v543_v7, 23  ;;  %v423_v31 = vadd.s32 %v422_v58, %v418_v48  ;;  %1315 = vst.msk [vmem:[#allocation2 + $0x60] sm:$0x1] %vm784_vm6, %v1310_v22  ;;  %v274_v56 = vand.u32 31, %v272_v10 }
  0x68   : > { %vm1197_vm14 = vcmp.eq.s32.totalorder %v2106_v40, 2  ;;  %v2213_v18 = vand.u32 3, %v1087_v63  ;;  %v2215_v19 = vshll.u32 %v268_v52, 8  ;;  %v2218_v46 = vand.u32 3, %v2037_v34 }
  0x69   : > { %v545_v3 = vor.u32 4788187, %v544_v11  ;;  %v548_v13 = vcvt.s32.f32 %v541_v0  ;;  %v424_v15 = vadd.s32 536870912, %v423_v31  ;;  %v2211_v2 = vpop.eup %1762  ;;  %v275_v30 = vsub.s32 32, %v274_v56 }
  0x6a   : > { %v2220_v29 = vpop.eup %1764  ;;  %v668_v21 = vxor.u32 2147483648, %v2211_v2  ;;  %v2224_v24 = vadd.s32 %v2172_v57, %v2159_v44  ;;  %v277_v36 = vshll.u32 %v1803_v33, %v274_v56  ;;  %v280_v43 = vshll.u32 %v1804_v35, %v274_v56 }
  0x6b   : > { %v546_v23 = vand.u32 2147483647, %v545_v3  ;;  %v2226_v27 = vshrl.u32 %v424_v15, 30  ;;  %v665_v28 = vxor.u32 2147483648, %v2220_v29  ;;  %v278_v12 = vshrl.u32 %v1804_v35, %v275_v30 }
  0x6c   : > { %v1199_v34 = vsel %vm1197_vm14, %v668_v21, %v2220_v29  ;;  %v281_v57 = vshrl.u32 %v1805_v37, %v275_v30  ;;  %v273_v35 = vshrl.u32 %v272_v10, 5  ;;  %v283_v26 = vshll.u32 %v1805_v37, %v274_v56 }
  0x6d   : > { %v549_v45 = vmul.f32 %v548_v13, %v546_v23  ;;  %v426_v44 = vshll.u32 %v2226_v27, 30  ;;  %v1196_v48 = vsel %vm1194_vm13, %v2211_v2, %v665_v28  ;;  %v286_v54 = vshll.u32 %v1806_v39, %v274_v56 }
  0x6e   : > { %v1336_v16 = vld [vmem:[#allocation2 + $0x60] sm:$0xff]  ;;  %v1200_v8 = vsel %vm1193_vm12, %v1196_v48, %v1199_v34  ;;  %v284_v63 = vshrl.u32 %v1806_v39, %v275_v30  ;;  %v276_v5 = vshrl.u32 %v1803_v33, %v275_v30  ;;  %v279_v4 = vor.u32 %v278_v12, %v277_v36 }
  0x6f   : > { %v550_v60 = vxor.u32 2147483648, %v549_v45  ;;  %v2251_v62 = vsub.s32 %v423_v31, %v426_v44  ;;  %1636 = vmatprep.subr.mxu0 %v1336_v16  ;;  %1677 = vmatprep.subr.mxu1 %v1336_v16  ;;  %v1201_v50 = vsel %vm661_vm10, nan, %v1200_v8  ;;  %v287_v37 = vshrl.u32 %v1807_v41, %v275_v30 }
  0x70   : > { %vm766_vm15 = vcmp.lt.s32.totalorder %v2218_v46, 2  ;;  %1637 = vmatpush3.msra.mxu0 %v1336_v16  ;;  %1693 = vmatpush3.msra.mxu1 %v1336_v16  ;;  %v1309_v40 = vmul.f32 %v1201_v50, %v2240_v47  ;;  %v282_v22 = vor.u32 %v281_v57, %v280_v43  ;;  %v289_v52 = vshll.u32 %v1807_v41, %v274_v56 }
  0x71   : > { %v551_v7 = vsel %vm468_vm11, %v550_v60, %v549_v45  ;;  %v429_v39 = vsub.s32 0, %v2251_v62  ;;  %v288_v33 = vor.u32 %v287_v37, %v286_v54  ;;  %v290_v10 = vshrl.u32 %v1808_v49, %v275_v30 }
  0x72   : > { %v554_v58 = vsel %vm2110_vm1, %v1884_v9, %v551_v7  ;;  %1314 = vst.msk [vmem:[#allocation2 + $0x58] sm:$0xff] %vm233_vm0, %v1309_v40  ;;  %v285_v11 = vor.u32 %v284_v63, %v283_v26  ;;  %vm292_vm2 = vcmp.lt.s32.totalorder %v273_v35, 1  ;;  %vm294_vm11 = vcmp.lt.s32.totalorder %v273_v35, 3 }
  0x73   : > { %1766 = vcosq.f32 %v554_v58  ;;  %v1568_v0 = vmin.u32 %v429_v39, %v2251_v62  ;;  %v291_v31 = vor.u32 %v290_v10, %v289_v52  ;;  %vm295_vm3 = vcmp.lt.s32.totalorder %v273_v35, 4  ;;  %v252_v10 = vld [vmem:[%s2168_s26 + $0x10] sm:$0xff] }
  0x74   : > { %1768 = vsinq.f32 %v554_v58  ;;  %vm293_vm5 = vcmp.lt.s32.totalorder %v273_v35, 2  ;;  %vm767_vm1 = vcmp.eq.s32.totalorder %v2218_v46, 0  ;;  %vm770_vm7 = vcmp.eq.s32.totalorder %v2218_v46, 2 }
  0x75   : > { %v431_v3 = vclz %v1568_v0  ;;  %v296_v41 = vsel %vm292_vm2, %v276_v5, %v279_v4  ;;  %v297_v49 = vsel %vm295_vm3, %v285_v11, 2102212464  ;;  %v300_v17 = vsel %vm292_vm2, %v279_v4, %v282_v22 }
  0x76   : > { %v301_v56 = vsel %vm295_vm3, %v288_v33, 920167782  ;;  %v298_v15 = vsel %vm294_vm11, %v282_v22, %v297_v49  ;;  %v304_v23 = vsel %vm292_vm2, %v282_v22, %v285_v11  ;;  %v305_v12 = vsel %vm295_vm3, %v291_v31, 1326507024 }
  0x77   : > { %v1569_v13 = vadd.s32 4294967294, %v431_v3  ;;  %v302_v30 = vsel %vm294_vm11, %v285_v11, %v301_v56  ;;  %v769_v43 = vsel %vm767_vm1, %v2153_v14, %v768_v38  ;;  %v662_v34 = vand.u32 3, %v2072_v20 }
  0x78   : > { %v303_v36 = vsel %vm293_vm5, %v300_v17, %v302_v30  ;;  %vm1090_vm8 = vcmp.eq.s32.totalorder %v2213_v18, 0  ;;  %v306_v45 = vsel %vm294_vm11, %v288_v33, %v305_v12  ;;  %vm1089_vm12 = vcmp.lt.s32.totalorder %v2213_v18, 2 }
  0x79   : > { %vm1570_vm9 = vcmp.lt.s32.totalorder %v1569_v13, 0  ;;  %v2285_v44 = vmul.u32.u64.low %v2215_v19, %v303_v36  ;;  %v2286_v57 = vmul.u32.u64.high %v2215_v19, %v303_v36, %v2285_v44  ;;  %v1335_v48 = vld [vmem:[#allocation2 + $0x58] sm:$0xff]  ;;  %v299_v54 = vsel %vm293_vm5, %v296_v41, %v298_v15 }
  0x7a   : > { %v434_v26 = vsel %vm1570_vm9, 0, %v1569_v13  ;;  %v307_v38 = vsel %vm293_vm5, %v304_v23, %v306_v45  ;;  %v772_v20 = vsel %vm770_vm7, %v771_v25, %v2161_v32  ;;  %1638 = vmatprep.subr.mxu0 %v1335_v48  ;;  %1678 = vmatprep.subr.mxu1 %v1335_v48  ;;  %vm558_vm13 = vweird.f32 %v1884_v9 }
  0x7b   : > { %v435_v16 = vsub.s32 32, %v434_v26  ;;  %v436_v8 = vshll.u32 %v2251_v62, %v434_v26  ;;  %v439_v60 = vsub.s32 4294967266, %v434_v26  ;;  %v773_v63 = vsel %vm766_vm15, %v769_v43, %v772_v20  ;;  %1639 = vmatpush3.msra.mxu0 %v1335_v48  ;;  %1694 = vmatpush3.msra.mxu1 %v1335_v48 }
  0x7c   : > { %v2302_v35 = vmul.u32.u64.low %v2215_v19, %v307_v38  ;;  %v2303_v50 = vmul.u32.u64.high %v2215_v19, %v307_v38, %v2302_v35  ;;  %v774_v14 = vsel %vm764_vm4, nan, %v773_v63  ;;  %vm663_vm14 = vcmp.lt.s32.totalorder %v662_v34, 2 }
  0x7d   : > { %v437_v32 = vshrl.u32 %v2224_v24, %v435_v16  ;;  %v440_v25 = vadd.s32 127, %v439_v60  ;;  %v318_v5 = vadd.s32 1, %v2286_v57  ;;  %v779_v62 = vmul.f32 %v774_v14, %v2189_v53 }
  0x7e   : > { %v315_v46 = vmul.u32 %v2215_v19, %v299_v54  ;;  %vm664_vm15 = vcmp.eq.s32.totalorder %v662_v34, 0  ;;  %vm667_vm2 = vcmp.eq.s32.totalorder %v662_v34, 2  ;;  %v559_v4 = vand.u32 3, %v2178_v42 }
  0x7f   : > { %v438_v37 = vor.u32 %v437_v32, %v436_v8  ;;  %v441_v40 = vshll.u32 %v440_v25, 23  ;;  %785 = vst.msk [vmem:[#allocation2 + $0x20] sm:$0x1] %vm784_vm6, %v779_v62  ;;  %v666_v1 = vsel %vm664_vm15, %v2211_v2, %v665_v28  ;;  %v669_v24 = vsel %vm667_vm2, %v668_v21, %v2220_v29 }
  0x80   : > { %v1767_v7 = vpop.eup %1766  ;;  %vm1093_vm4 = vcmp.eq.s32.totalorder %v2213_v18, 2  ;;  %vm317_vm11 = vc.u32 %v2303_v50, %v2285_v44  ;;  %v670_v42 = vsel %vm663_vm14, %v666_v1, %v669_v24  ;;  %vm560_vm3 = vcmp.lt.s32.totalorder %v559_v4, 2 }
  0x81   : > { %v1769_v53 = vpop.eup %1768  ;;  %v565_v19 = vxor.u32 2147483648, %v1767_v7  ;;  %v442_v39 = vor.u32 4788187, %v441_v40  ;;  %v445_v22 = vcvt.s32.f32 %v438_v37  ;;  %v319_v28 = vsel %vm317_vm11, %v318_v5, %v2286_v57  ;;  %v251_v37 = vld [vmem:[%s2168_s26 + $0x8] sm:$0xff] }
  0x82   : > { %v562_v58 = vxor.u32 2147483648, %v1769_v53  ;;  %v320_v33 = vadd.s32 %v319_v28, %v315_v46  ;;  %v671_v2 = vsel %vm661_vm10, nan, %v670_v42  ;;  %vm561_vm6 = vcmp.eq.s32.totalorder %v559_v4, 0 }
  0x83   : > { %v1095_v29 = vsel %vm1093_vm4, %v565_v19, %v1769_v53  ;;  %v443_v21 = vand.u32 2147483647, %v442_v39  ;;  %v778_v52 = vmul.f32 %v671_v2, %v2240_v47  ;;  %vm564_vm5 = vcmp.eq.s32.totalorder %v559_v4, 2 }
  0x84   : > { %v1092_v0 = vsel %vm1090_vm8, %v1767_v7, %v562_v58  ;;  %v321_v11 = vadd.s32 536870912, %v320_v33  ;;  %v563_v31 = vsel %vm561_vm6, %v1767_v7, %v562_v58  ;;  %v566_v3 = vsel %vm564_vm5, %v565_v19, %v1769_v53 }
  0x85   : > { %v1096_v41 = vsel %vm1089_vm12, %v1092_v0, %v1095_v29  ;;  %vm365_vm1 = vcmp.lt.s32.totalorder %v1954_v51, 0  ;;  %v446_v6 = vmul.f32 %v445_v22, %v443_v21  ;;  %783 = vst.msk [vmem:[#allocation2 + $0x18] sm:$0xff] %vm233_vm0, %v778_v52  ;;  %v567_v49 = vsel %vm560_vm3, %v563_v31, %v566_v3 }
  0x86   : > { %v1097_v47 = vsel %vm558_vm13, nan, %v1096_v41  ;;  %v449_v17 = vsub.s32 4, %v2226_v27  ;;  %v2338_v56 = vshrl.u32 %v321_v11, 30  ;;  %v568_v13 = vsel %vm558_vm13, nan, %v567_v49 }
  0x87   : > { %v1308_v15 = vmul.f32 %v1097_v47, %v252_v10  ;;  %vm364_vm10 = vcmp.le.f32.partialorder %v363_v55, 0.7853982  ;;  %v447_v18 = vxor.u32 2147483648, %v446_v6  ;;  %v777_v30 = vmul.f32 %v568_v13, %v252_v10 }
  0x88   : > { %v323_v23 = vshll.u32 %v2338_v56, 30  ;;  %v450_v9 = vsel %vm365_vm1, %v449_v17, %v2226_v27  ;;  %v316_v27 = vadd.s32 %v2285_v44, %v2303_v50  ;;  %vm455_vm2 = vweird.f32 %v1954_v51 }
  0x89   : > { %1313 = vst.msk [vmem:[#allocation2 + $0x50] sm:$0xff] %vm233_vm0, %v1308_v15  ;;  %v448_v36 = vsel %vm365_vm1, %v447_v18, %v446_v6  ;;  %782 = vst.msk [vmem:[#allocation2 + $0x10] sm:$0xff] %vm233_vm0, %v777_v30  ;;  %v452_v34 = vsel %vm364_vm10, 0, %v450_v9  ;;  %vm262_vm4 = vcmp.lt.s32.totalorder %v2063_v59, 0  ;;  %vm261_vm11 = vcmp.le.f32.partialorder %v260_v61, 0.7853982 }
  0x8a   : > { %v451_v12 = vsel %vm364_vm10, %v1954_v51, %v448_v36  ;;  %v324_v43 = vsub.s32 %v320_v33, %v323_v23  ;;  %v983_v48 = vadd.s32 3, %v452_v34  ;;  %v456_v20 = vand.u32 3, %v452_v34  ;;  %v1329_v34 = vld [vmem:[#allocation2 + $0x28] sm:$0xff] }
  0x8b   : > { %1770 = vcosq.f32 %v451_v12  ;;  %v346_v51 = vsub.s32 4, %v2338_v56 }
  0x8c   : > { %1772 = vsinq.f32 %v451_v12  ;;  %v326_v55 = vsub.s32 0, %v324_v43  ;;  %v984_v38 = vand.u32 3, %v983_v48  ;;  %vm461_vm9 = vcmp.eq.s32.totalorder %v456_v20, 2 }
  0x8d   : > { %vm458_vm14 = vcmp.eq.s32.totalorder %v456_v20, 0  ;;  %vm457_vm15 = vcmp.lt.s32.totalorder %v456_v20, 2  ;;  %v347_v21 = vsel %vm262_vm4, %v346_v51, %v2338_v56  ;;  %v250_v56 = vld [vmem:[%s2168_s26] sm:$0xff]  ;;  %v1318_v20 = vld [vmem:[%s2410_s2 + $0x10] sm:$0xff] }
  0x8e   : > { %v1564_v45 = vmin.u32 %v326_v55, %v324_v43  ;;  %vm989_vm8 = vcmp.eq.s32.totalorder %v984_v38, 2  ;;  %vm985_vm12 = vcmp.lt.s32.totalorder %v984_v38, 2  ;;  %vm986_vm13 = vcmp.eq.s32.totalorder %v984_v38, 0  ;;  %v1331_v55 = vld [vmem:[#allocation2 + $0x38] sm:$0xff]  ;;  %v1317_v38 = vld [vmem:[%s2410_s2 + $0x8] sm:$0xff] }
  0x8f   : > { %v349_v0 = vsel %vm261_vm11, 0, %v347_v21 }
  0x90   : > { %v1334_v57 = vld [vmem:[#allocation2 + $0x50] sm:$0xff]  ;;  %v328_v26 = vclz %v1564_v45  ;;  %v879_v11 = vadd.s32 3, %v349_v0  ;;  %v353_v3 = vand.u32 3, %v349_v0  ;;  %v1328_v45 = vld [vmem:[#allocation2 + $0x20] sm:$0xff] }
  0x91   : > { %1640 = vmatprep.subr.mxu0 %v1334_v57  ;;  %1679 = vmatprep.subr.mxu1 %v1334_v57  ;;  %v1326_v48 = vld [vmem:[#allocation2 + $0x10] sm:$0xff] }
  0x92   : > { %1641 = vmatpush3.msra.mxu0 %v1334_v57  ;;  %1695 = vmatpush3.msra.mxu1 %v1334_v57  ;;  %v1565_v54 = vadd.s32 4294967294, %v328_v26  ;;  %v880_v31 = vand.u32 3, %v879_v11  ;;  %vm358_vm6 = vcmp.eq.s32.totalorder %v353_v3, 2  ;;  %vm355_vm1 = vcmp.eq.s32.totalorder %v353_v3, 0  ;;  %v1327_v57 = vld [vmem:[#allocation2 + $0x18] sm:$0xff] }
  0x94   : > { %vm1566_vm7 = vcmp.lt.s32.totalorder %v1565_v54, 0  ;;  %vm885_vm3 = vcmp.eq.s32.totalorder %v880_v31, 2  ;;  %vm882_vm5 = vcmp.eq.s32.totalorder %v880_v31, 0  ;;  %vm881_vm10 = vcmp.lt.s32.totalorder %v880_v31, 2 }
  0x95   : > { %v331_v16 = vsel %vm1566_vm7, 0, %v1565_v54  ;;  %vm354_vm7 = vcmp.lt.s32.totalorder %v353_v3, 2 }
  0x96   : > { %v332_v8 = vsub.s32 32, %v331_v16  ;;  %v333_v60 = vshll.u32 %v324_v43, %v331_v16  ;;  %v336_v63 = vsub.s32 4294967266, %v331_v16  ;;  %v1322_v16 = vld [vmem:[%s2410_s2 + $0x30] sm:$0xff] }
  0x98   : > { %v1771_v35 = vpop.eup %1770  ;;  %v334_v14 = vshrl.u32 %v316_v27, %v332_v8  ;;  %v337_v32 = vadd.s32 127, %v336_v63  ;;  %v1321_v27 = vld [vmem:[%s2410_s2 + $0x28] sm:$0xff]  ;;  %v1319_v8 = vld [vmem:[%s2410_s2 + $0x18] sm:$0xff] }
  0x99   : > { %v1773_v25 = vpop.eup %1772  ;;  %v462_v5 = vxor.u32 2147483648, %v1771_v35 }
  0x9a   : > { %v459_v62 = vxor.u32 2147483648, %v1773_v25  ;;  %v335_v46 = vor.u32 %v334_v14, %v333_v60  ;;  %v338_v44 = vshll.u32 %v337_v32, 23  ;;  %v1323_v60 = vld [vmem:[%s2410_s2 + $0x38] sm:$0xff] }
  0x9b   : > { %v991_v50 = vsel %vm989_vm8, %v462_v5, %v1773_v25  ;;  %v463_v4 = vsel %vm461_vm9, %v462_v5, %v1773_v25  ;;  %vm352_vm8 = vweird.f32 %v2063_v59 }
  0x9c   : > { %v988_v40 = vsel %vm986_vm13, %v1771_v35, %v459_v62  ;;  %v339_v1 = vor.u32 4788187, %v338_v44  ;;  %v342_v24 = vcvt.s32.f32 %v335_v46  ;;  %v460_v7 = vsel %vm458_vm14, %v1771_v35, %v459_v62 }
  0x9d   : > { %v992_v42 = vsel %vm985_vm12, %v988_v40, %v991_v50  ;;  %v464_v53 = vsel %vm457_vm15, %v460_v7, %v463_v4 }
  0x9e   : > { %v993_v19 = vsel %vm455_vm2, nan, %v992_v42  ;;  %v340_v39 = vand.u32 2147483647, %v339_v1  ;;  %v465_v22 = vsel %vm455_vm2, nan, %v464_v53 }
  0x9f   : > { %v1307_v28 = vmul.f32 %v993_v19, %v251_v37  ;;  %v776_v58 = vmul.f32 %v465_v22, %v251_v37 }
  0xa0   : > { %v343_v33 = vmul.f32 %v342_v24, %v340_v39 }
  0xa1   : > { %1312 = vst.msk [vmem:[#allocation2 + $0x48] sm:$0xff] %vm233_vm0, %v1307_v28  ;;  %781 = vst.msk [vmem:[#allocation2 + $0x8] sm:$0xff] %vm233_vm0, %v776_v58 }
  0xa2   : > { %v344_v2 = vxor.u32 2147483648, %v343_v33 }
  0xa4   : > { %v345_v29 = vsel %vm262_vm4, %v344_v2, %v343_v33 }
  0xa5   : > { %v348_v52 = vsel %vm261_vm11, %v2063_v59, %v345_v29  ;;  %v1330_v59 = vld [vmem:[#allocation2 + $0x30] sm:$0xff] }
  0xa6   : > { %1774 = vcosq.f32 %v348_v52 }
  0xa7   : > { %1776 = vsinq.f32 %v348_v52 }
  0xa8   : > { %v1333_v10 = vld [vmem:[#allocation2 + $0x48] sm:$0xff] }
  0xa9   : > { %1642 = vmatprep.subr.mxu0 %v1333_v10  ;;  %1680 = vmatprep.subr.mxu1 %v1333_v10  ;;  %v1325_v26 = vld [vmem:[#allocation2 + $0x8] sm:$0xff] }
  0xaa   : > { %1643 = vmatpush3.msra.mxu0 %v1333_v10  ;;  %1696 = vmatpush3.msra.mxu1 %v1333_v10 }
  0xb3   : > { %v1775_v41 = vpop.eup %1774 }
  0xb4   : > { %v1777_v61 = vpop.eup %1776  ;;  %v359_v6 = vxor.u32 2147483648, %v1775_v41 }
  0xb5   : > { %v356_v49 = vxor.u32 2147483648, %v1777_v61 }
  0xb6   : > { %v887_v47 = vsel %vm885_vm3, %v359_v6, %v1777_v61  ;;  %v360_v17 = vsel %vm358_vm6, %v359_v6, %v1777_v61 }
  0xb7   : > { %v884_v13 = vsel %vm882_vm5, %v1775_v41, %v356_v49  ;;  %v357_v15 = vsel %vm355_vm1, %v1775_v41, %v356_v49 }
  0xb8   : > { %v888_v18 = vsel %vm881_vm10, %v884_v13, %v887_v47  ;;  %v361_v30 = vsel %vm354_vm7, %v357_v15, %v360_v17 }
  0xb9   : > { %v889_v23 = vsel %vm352_vm8, nan, %v888_v18  ;;  %v362_v36 = vsel %vm352_vm8, nan, %v361_v30 }
  0xba   : > { %v1306_v9 = vmul.f32 %v889_v23, %v250_v56  ;;  %v775_v12 = vmul.f32 %v362_v36, %v250_v56 }
  0xbc   : > { %1311 = vst.msk [vmem:[#allocation2 + $0x40] sm:$0xff] %vm233_vm0, %v1306_v9  ;;  %780 = vst.msk [vmem:[#allocation2] sm:$0xff] %vm233_vm0, %v775_v12 }
  0xc3   : > { %v1332_v43 = vld [vmem:[#allocation2 + $0x40] sm:$0xff] }
  0xc4   : > { %1644 = vmatprep.subr.mxu0 %v1332_v43  ;;  %1681 = vmatprep.subr.mxu1 %v1332_v43  ;;  %v1324_v54 = vld [vmem:[#allocation2] sm:$0xff] }
  0xc5   : > { %1645 = vmatpush3.msra.mxu0 %v1332_v43  ;;  %1697 = vmatpush3.msra.mxu1 %v1332_v43 }
  0xc6   : > { %1646 = vmatprep.subr.mxu0 %v1331_v55  ;;  %1682 = vmatprep.subr.mxu1 %v1331_v55 }
  0xc7   : > { %1647 = vmatpush3.msra.mxu0 %v1331_v55  ;;  %1698 = vmatpush3.msra.mxu1 %v1331_v55 }
  0xc8   : > { %1648 = vmatprep.subr.mxu0 %v1330_v59  ;;  %1683 = vmatprep.subr.mxu1 %v1330_v59 }
  0xc9   : > { %1649 = vmatpush3.msra.mxu0 %v1330_v59  ;;  %1699 = vmatpush3.msra.mxu1 %v1330_v59 }
  0xca   : > { %1650 = vmatprep.subr.mxu0 %v1329_v34  ;;  %1684 = vmatprep.subr.mxu1 %v1329_v34 }
  0xcb   : > { %1651 = vmatpush3.msra.mxu0 %v1329_v34  ;;  %1700 = vmatpush3.msra.mxu1 %v1329_v34 }
  0xcc   : > { %1652 = vmatprep.subr.mxu0 %v1328_v45  ;;  %1685 = vmatprep.subr.mxu1 %v1328_v45 }
  0xcd   : > { %1653 = vmatpush3.msra.mxu0 %v1328_v45  ;;  %1701 = vmatpush3.msra.mxu1 %v1328_v45 }
  0xce   : > { %1654 = vmatprep.subr.mxu0 %v1327_v57  ;;  %1686 = vmatprep.subr.mxu1 %v1327_v57 }
  0xcf   : > { %1655 = vmatpush3.msra.mxu0 %v1327_v57  ;;  %1702 = vmatpush3.msra.mxu1 %v1327_v57 }
  0xd0   : > { %1656 = vmatprep.subr.mxu0 %v1326_v48  ;;  %1687 = vmatprep.subr.mxu1 %v1326_v48 }
  0xd1   : > { %1657 = vmatpush3.msra.mxu0 %v1326_v48  ;;  %1703 = vmatpush3.msra.mxu1 %v1326_v48 }
  0xd2   : > { %1658 = vmatprep.subr.mxu0 %v1325_v26  ;;  %1688 = vmatprep.subr.mxu1 %v1325_v26 }
  0xd3   : > { %1659 = vmatpush3.msra.mxu0 %v1325_v26  ;;  %1704 = vmatpush3.msra.mxu1 %v1325_v26 }
  0xd4   : > { %1660 = vmatprep.subr.mxu0 %v1324_v54  ;;  %1689 = vmatprep.subr.mxu1 %v1324_v54 }
  0xd5   : > { %1661 = vmatpush3.msra.mxu0 %v1324_v54  ;;  %1705 = vmatpush3.msra.mxu1 %v1324_v54 }
  0xd6   : > { %1663 = vmatmul.mubr.f32.vlgmr.msra.gmra.mxu0 %v1317_v38  ;;  %1669 = vmatmul.mubr.f32.vlgmr.msra.gmra.mxu1 %v1321_v27 }
  0xd7   : > { %1665 = vmatprep.mubr.f32.mxu0 %v1318_v20  ;;  %1671 = vmatprep.mubr.f32.mxu1 %v1322_v16 }
  0xda   : > { %1666 = vmatmul.mubr.f32.gmra.mxu0 %v1319_v8  ;;  %1672 = vmatmul.mubr.f32.gmra.mxu1 %v1323_v60 }
 0x196   : > { %v1664_v63 = vpop.f32.mrf.mxu0  ;;  %v1670_v35 = vpop.f32.mrf.mxu1 }
 0x197   : > { %1446 = vst.msk [vmem:[%s232_s19 + $0x8] sm:$0xff] %vm233_vm0, %v1664_v63  ;;  %1450 = vst.msk [vmem:[%s232_s19 + $0x28] sm:$0xff] %vm233_vm0, %v1670_v35 }
 0x198   : > { %v1406_v14 = vpop.f32.mrf.mxu0  ;;  %v1426_v32 = vpop.f32.mrf.mxu1 }
 0x199   : > { %1445 = vst.msk [vmem:[%s232_s19] sm:$0xff] %vm233_vm0, %v1406_v14  ;;  %1449 = vst.msk [vmem:[%s232_s19 + $0x20] sm:$0xff] %vm233_vm0, %v1426_v32 }
 0x19a   : > { %v1667_v25 = vpop.f32.mrf.mxu0  ;;  %v1673_v5 = vpop.f32.mrf.mxu1 }
 0x19b   : > { %1448 = vst.msk [vmem:[%s232_s19 + $0x18] sm:$0xff] %vm233_vm0, %v1667_v25  ;;  %1452 = vst.msk [vmem:[%s232_s19 + $0x38] sm:$0xff] %vm233_vm0, %v1673_v5 }
 0x19c   : > { %v1416_v62 = vpop.f32.mrf.mxu0  ;;  %v1436_v46 = vpop.f32.mrf.mxu1 }
 0x19d   : > { %1447 = vst.msk [vmem:[%s232_s19 + $0x10] sm:$0xff] %vm233_vm0, %v1416_v62  ;;  %1451 = vst.msk [vmem:[%s232_s19 + $0x30] sm:$0xff] %vm233_vm0, %v1436_v46 }
 0x19e PF: > { %s13_s14 = sadd.s32 1, %s1800_s14   ;;  %s2418_s12 = smov %s1796_s13 }
 0x19f   : > { %p10_p5 = scmp.ge.s32.totalorder %s13_s14, 4   ;;  %s2419_s13 = smov %s2421_s15 }
 0x1a1   :  { %12 = sbr.rel (!%p10_p5) target bundleno = 2 (0x2), region = 65 }

</bundles_post_ra>
